<compile_context>
chip_gen: v6e
topology: v6e:2x2x1
jax: 0.10.0
libtpu: 0.0.40
codegen_flags: <defaults>
</compile_context>

<pallas_src>
import math
import jax
import jax.numpy as jnp
from jax.experimental import pallas as pl
from jax.experimental.pallas import tpu as pltpu

_LANE = 128
_SUBLANE = 8
_MEGACORE_N = 256          # row count above which we insist on grid_m >= 2, even


def _round_up(n, m):
    return ((n + m - 1) // m) * m


def _cdiv(a, b):
    return -(-a // b)


def _vmem_caps():
    """(scoped vmem limit, planning budget) per TPU generation."""
    cap = None
    try:
        info = pltpu.get_tpu_info()
        cap = getattr(info, "vmem_capacity_bytes", None)
    except Exception:
        cap = None
    if cap is None:
        cap = 64 * 1024 * 1024                      # assume v7x-sized if unknown
    if cap >= 128 * 1024 * 1024:                    # v5e / v6e
        return 96 * 1024 * 1024, 64 * 1024 * 1024
    return 48 * 1024 * 1024, 24 * 1024 * 1024       # v7x (64 MiB physical)


def _pad_cast(a, target_shape, dtype):
    """Cast/zero-pad only when needed (avoids materializing extra HBM copies)."""
    if a.dtype != dtype:
        a = a.astype(dtype)
    pads = tuple((0, t - s) for s, t in zip(a.shape, target_shape))
    if any(p[1] for p in pads):
        a = jnp.pad(a, pads)
    return a


# ---------------------------------------------------------------------------
# Kernels
# ---------------------------------------------------------------------------
def _support_kernel(x_ref, w_ref, s_ref):
    # support_tile = x_tile @ W   (W resident across the row grid)
    s_ref[...] = jnp.dot(
        x_ref[...], w_ref[...], preferred_element_type=jnp.float32
    ).astype(s_ref.dtype)


def _make_adj_support_kernel(has_bias):
    """out_tile = sum_k adj[:, k] @ support[k, :]  (+ bias)."""
    def body(adj_ref, s_ref, *rest):
        if has_bias:
            b_ref, out_ref, acc_ref = rest
        else:
            out_ref, acc_ref = rest
        k = pl.program_id(1)

        @pl.when(k == 0)
        def _():
            acc_ref[...] = jnp.zeros_like(acc_ref)

        acc_ref[...] += jnp.dot(adj_ref[...], s_ref[...],
                                preferred_element_type=jnp.float32)

        @pl.when(k == pl.num_programs(1) - 1)
        def _():
            acc = acc_ref[...]
            if has_bias:
                acc = acc + b_ref[...]
            out_ref[...] = acc.astype(out_ref.dtype)

    return body


def _make_adj_x_w_kernel(has_bias):
    """out_tile = (sum_k adj[:, k] @ x[k, :]) @ W  (+ bias); in_f < out_f path.

    NOTE: reassociation ((adj@x)@W vs adj@(x@W)) changes summation order vs.
    the torch reference, and with a bf16 compute dtype the (adj@x) partial sum
    is rounded to bf16 before the second MXU pass (one extra rounding step that
    the precomputed-support branch does not have). Accumulation is always f32.
    """
    def body(adj_ref, x_ref, w_ref, *rest):
        if has_bias:
            b_ref, out_ref, acc_ref = rest
        else:
            out_ref, acc_ref = rest
        k = pl.program_id(1)

        @pl.when(k == 0)
        def _():
            acc_ref[...] = jnp.zeros_like(acc_ref)

        acc_ref[...] += jnp.dot(adj_ref[...], x_ref[...],
                                preferred_element_type=jnp.float32)

        @pl.when(k == pl.num_programs(1) - 1)
        def _():
            acc = jnp.dot(acc_ref[...].astype(w_ref.dtype), w_ref[...],
                          preferred_element_type=jnp.float32)
            if has_bias:
                acc = acc + b_ref[...]
            out_ref[...] = acc.astype(out_ref.dtype)

    return body


# ---------------------------------------------------------------------------
# Tile planning
# ---------------------------------------------------------------------------
def _plan_main(N, item, out_item, sub, f_res_p, out_f_p, acc_cols, w_res_bytes,
               budget, desired_tm=512, desired_tk=2048):
    """Pick (tm, tk, grid_m, grid_k, n_rows_pad, n_k_pad) for the adj matmul."""

    def est(tm, tk):
        return (2 * tm * tk * item              # adj tile (double-buffered)
                + 2 * tk * f_res_p * item       # K-operand tile (double-buffered)
                + w_res_bytes                   # resident W (reassoc path)
                + 2 * tm * out_f_p * out_item   # output tile (double-buffered)
                + tm * acc_cols * 4             # f32 accumulator scratch
                + 2 * out_f_p * 4)              # bias row

    # --- preferred: single K block (tk == N -> NO adj column padding/copy) ---
    tm = min(_round_up(desired_tm, sub), _round_up(N, sub))
    while tm > sub and est(tm, N) > budget:
        tm = max(sub, (tm // (2 * sub)) * sub)
    if est(tm, N) <= budget:
        tk, grid_k, n_k_pad = N, 1, N
        if N <= tm and N < _MEGACORE_N:
            # single row tile == full rows: adj needs no padding at all
            return N, tk, 1, grid_k, N, n_k_pad
        if N <= tm:                              # big enough to want 2 TCs (v7x)
            tm = _round_up(_cdiv(N, 2), sub)
        grid_m = _cdiv(N, tm)
        if grid_m > 1 and grid_m % 2 == 1 and N >= _MEGACORE_N:
            tm = _round_up(_cdiv(N, grid_m + 1), sub)
            grid_m = _cdiv(N, tm)
        return tm, tk, grid_m, grid_k, grid_m * tm, n_k_pad

    # --- fallback: K-tiled reduction (large N; adj cols padded to tk) ---
    tm = min(_round_up(desired_tm, sub), _round_up(N, sub))
    tk = min(_round_up(desired_tk, _LANE), _round_up(N, _LANE))
    while est(tm, tk) > budget and (tm > sub or tk > _LANE):
        if tk >= 2 * tm and tk > _LANE:
            tk = max(_LANE, (tk // (2 * _LANE)) * _LANE)
        elif tm > sub:
            tm = max(sub, (tm // (2 * sub)) * sub)
        else:
            tk = max(_LANE, (tk // (2 * _LANE)) * _LANE)
    grid_m = _cdiv(N, tm)
    if grid_m > 1 and grid_m % 2 == 1 and N >= _MEGACORE_N:
        tm = _round_up(_cdiv(N, grid_m + 1), sub)
        grid_m = _cdiv(N, tm)
    grid_k = _cdiv(N, tk)
    return tm, tk, grid_m, grid_k, grid_m * tm, grid_k * tk


def _choose_tr(n_rows, in_f_p, out_f_p, item, sub, budget, desired=512):
    """Row tile for the support precompute (x @ W) with W resident."""
    tr = min(_round_up(desired, sub), _round_up(n_rows, sub))

    def est(t):
        return (2 * t * in_f_p * item + 2 * in_f_p * out_f_p * item
                + 2 * t * out_f_p * item)

    while tr > sub and est(tr) > budget:
        tr = max(sub, (tr // (2 * sub)) * sub)
    return tr


# ---------------------------------------------------------------------------
# Wrapper
# ---------------------------------------------------------------------------
def graph_convolution(x, adj, weight, bias=None, *, compute_dtype=None,
                      row_tile=512, k_tile=2048):
    """Pallas implementation of GraphConvolution.forward.

    x:      (N, in_features)
    adj:    (N, N)
    weight: (in_features, out_features)
    bias:   optional (1, 1, out_features) -> output becomes (1, N, out_features)
    compute_dtype: optional matmul-input dtype (e.g. jnp.bfloat16 to halve the
                   N^2 adj HBM traffic and hit the native MXU path); MXU
                   accumulation stays f32 and the output keeps x.dtype.
                   Default is x.dtype to preserve the torch module's numerics.
    """
    N, in_f = x.shape
    assert adj.shape == (N, N)
    assert weight.shape[0] == in_f
    out_f = weight.shape[1]
    out_dtype = x.dtype

    cdt = jnp.dtype(compute_dtype) if compute_dtype is not None else jnp.dtype(x.dtype)
    item = cdt.itemsize
    out_item = jnp.dtype(out_dtype).itemsize
    sub = max(_SUBLANE, 32 // item)          # 8 for f32, 16 for bf16

    in_f_p = _round_up(in_f, _LANE)
    out_f_p = _round_up(out_f, _LANE)

    vmem_limit, vmem_budget = _vmem_caps()

    # Branch on the TRUE feature dims (not padded ones).
    reassoc = in_f < out_f
    if reassoc:
        f_res_p, acc_cols = in_f_p, in_f_p + out_f_p
        w_res_bytes = 2 * in_f_p * out_f_p * item
    else:
        f_res_p, acc_cols = out_f_p, out_f_p
        w_res_bytes = 0

    tm, tk, grid_m, grid_k, n_rows_pad, n_k_pad = _plan_main(
        N, item, out_item, sub, f_res_p, out_f_p, acc_cols, w_res_bytes,
        vmem_budget, desired_tm=row_tile, desired_tk=k_tile)

    # adj is only copied if a cast or padding is actually required.
    adj_p = _pad_cast(adj, (n_rows_pad, n_k_pad), cdt)
    w_p = _pad_cast(weight, (in_f_p, out_f_p), cdt)

    has_bias = bias is not None
    if has_bias:
        b_p = _pad_cast(bias.reshape(1, out_f), (1, out_f_p), jnp.float32)

    cparams = pltpu.CompilerParams(
        dimension_semantics=("parallel", "arbitrary"),
        vmem_limit_bytes=vmem_limit)
    out_bytes = n_rows_pad * out_f_p * out_item

    if reassoc:
        # out = (adj @ x) @ W, K-accumulated per row tile (in_f < out_f).
        x_p = _pad_cast(x, (n_k_pad, in_f_p), cdt)
        flops = 2 * n_rows_pad * n_k_pad * in_f_p + 2 * n_rows_pad * in_f_p * out_f_p
        bytes_in = (adj_p.size + x_p.size + w_p.size) * item + (out_f_p * 4 if has_bias else 0)

        in_specs = [
            pl.BlockSpec((tm, tk), lambda i, k: (i, k)),          # adj tile
            pl.BlockSpec((tk, in_f_p), lambda i, k: (k, 0)),      # x K-slab
            pl.BlockSpec((in_f_p, out_f_p), lambda i, k: (0, 0)),  # W (resident)
        ]
        args = [adj_p, x_p, w_p]
        if has_bias:
            in_specs.append(pl.BlockSpec((1, out_f_p), lambda i, k: (0, 0)))
            args.append(b_p)

        out_p = pl.pallas_call(
            _make_adj_x_w_kernel(has_bias),
            out_shape=jax.ShapeDtypeStruct((n_rows_pad, out_f_p), out_dtype),
            grid=(grid_m, grid_k),
            in_specs=in_specs,
            out_specs=pl.BlockSpec((tm, out_f_p), lambda i, k: (i, 0)),
            scratch_shapes=[pltpu.VMEM((tm, in_f_p), jnp.float32)],
            compiler_params=cparams,
            cost_estimate=pl.CostEstimate(flops=flops, transcendentals=0,
                                          bytes_accessed=bytes_in + out_bytes),
        )(*args)
    else:
        # Hoisted support = x @ W, row-tiled (W resident), then adj @ support.
        # TODO(synk): for very large in_features the precompute should also
        # K-tile over in_f; ML-GCN feature dims are small so rows-only is fine.
        tr = _choose_tr(n_k_pad, in_f_p, out_f_p, item, sub, vmem_budget,
                        desired=row_tile)
        if tr >= n_k_pad:
            tr, n_s_pad = n_k_pad, n_k_pad
        else:
            n_s_pad = _round_up(n_k_pad, tr)
        grid_r = n_s_pad // tr
        x_p = _pad_cast(x, (n_s_pad, in_f_p), cdt)

        support = pl.pallas_call(
            _support_kernel,
            out_shape=jax.ShapeDtypeStruct((n_s_pad, out_f_p), cdt),
            grid=(grid_r,),
            in_specs=[pl.BlockSpec((tr, in_f_p), lambda i: (i, 0)),
                      pl.BlockSpec((in_f_p, out_f_p), lambda i: (0, 0))],
            out_specs=pl.BlockSpec((tr, out_f_p), lambda i: (i, 0)),
            compiler_params=pltpu.CompilerParams(
                dimension_semantics=("parallel",),
                vmem_limit_bytes=vmem_limit),
            cost_estimate=pl.CostEstimate(
                flops=2 * n_s_pad * in_f_p * out_f_p, transcendentals=0,
                bytes_accessed=(x_p.size + w_p.size + n_s_pad * out_f_p) * item),
        )(x_p, w_p)

        flops = 2 * n_rows_pad * n_k_pad * out_f_p
        bytes_in = (adj_p.size + n_k_pad * out_f_p) * item + (out_f_p * 4 if has_bias else 0)

        in_specs = [
            pl.BlockSpec((tm, tk), lambda i, k: (i, k)),          # adj tile
            pl.BlockSpec((tk, out_f_p), lambda i, k: (k, 0)),     # support K-slab
        ]
        args = [adj_p, support]
        if has_bias:
            in_specs.append(pl.BlockSpec((1, out_f_p), lambda i, k: (0, 0)))
            args.append(b_p)

        out_p = pl.pallas_call(
            _make_adj_support_kernel(has_bias),
            out_shape=jax.ShapeDtypeStruct((n_rows_pad, out_f_p), out_dtype),
            grid=(grid_m, grid_k),
            in_specs=in_specs,
            out_specs=pl.BlockSpec((tm, out_f_p), lambda i, k: (i, 0)),
            scratch_shapes=[pltpu.VMEM((tm, out_f_p), jnp.float32)],
            compiler_params=cparams,
            cost_estimate=pl.CostEstimate(flops=flops, transcendentals=0,
                                          bytes_accessed=bytes_in + out_bytes),
        )(*args)

    out = out_p[:N, :out_f]
    if has_bias:
        # torch broadcasting: (N, out_f) + (1, 1, out_f) -> (1, N, out_f)
        out = out.reshape(1, N, out_f)
    return out


def init_params(key, in_features, out_features, bias=False, dtype=jnp.float32):
    """Deterministic re-implementation of reset_parameters()."""
    stdv = 1.0 / math.sqrt(out_features)
    kw, kb = jax.random.split(key)
    weight = jax.random.uniform(
        kw, (in_features, out_features), dtype=dtype, minval=-stdv, maxval=stdv)
    b = None
    if bias:
        b = jax.random.uniform(
            kb, (1, 1, out_features), dtype=dtype, minval=-stdv, maxval=stdv)
    return weight, b


if __name__ == "__main__":
    key = jax.random.PRNGKey(0)
    k_x, k_adj, k_p1, k_p2 = jax.random.split(key, 4)

    # Small shapes consistent with ML-GCN usage: N label-nodes, two GCN layers.
    N = 20
    in_f1, out_f1 = 32, 64   # in < out  -> fused (adj @ x) @ W path
    in_f2, out_f2 = 64, 16   # in >= out -> precomputed-support path (+ bias)

    x = jax.random.normal(k_x, (N, in_f1), dtype=jnp.float32)
    adj_raw = jax.random.uniform(k_adj, (N, N), dtype=jnp.float32)
    adj = adj_raw / jnp.sum(adj_raw, axis=-1, keepdims=True)  # row-normalized

    w1, b1 = init_params(k_p1, in_f1, out_f1, bias=False)
    w2, b2 = init_params(k_p2, in_f2, out_f2, bias=True)

    out1 = graph_convolution(x, adj, w1, b1)            # (N, out_f1)
    h = jax.nn.relu(out1)
    out2 = graph_convolution(h, adj, w2, b2)            # (1, N, out_f2) due to bias
    jax.block_until_ready((out1, out2))

    # Pure-JAX references (layer 1 differs only by matmul reassociation).
    ref1 = adj @ (x @ w1)
    ref2 = (adj @ (jax.nn.relu(ref1) @ w2)) + b2

    assert out1.shape == ref1.shape, (out1.shape, ref1.shape)
    assert out2.shape == ref2.shape, (out2.shape, ref2.shape)
    assert jnp.allclose(out1, ref1, atol=1e-4, rtol=1e-4)
    assert jnp.allclose(out2, ref2, atol=1e-4, rtol=1e-4)

    # Optional bf16 compute path (f32 MXU accumulation) — loose tolerance check.
    out_bf16 = graph_convolution(x, adj, w1, None, compute_dtype=jnp.bfloat16)
    out_bf16 = jax.block_until_ready(out_bf16)
    assert float(jnp.max(jnp.abs(out_bf16 - ref1))) < 5e-2

    print("KERNEL_OK")
</pallas_src>

<mosaic_0001>
module attributes {stable_mosaic.version = 11 : i64} {
  func.func @body(%arg0: i32, %arg1: i32, %arg2: memref<20x20xf32, #tpu.memory_space<vmem>>, %arg3: memref<20x128xf32, #tpu.memory_space<vmem>>, %arg4: memref<128x128xf32, #tpu.memory_space<vmem>>, %arg5: memref<20x128xf32, #tpu.memory_space<vmem>>, %arg6: memref<20x128xf32, #tpu.memory_space<vmem>>) attributes {dimension_semantics = [#tpu.dimension_semantics<parallel>, #tpu.dimension_semantics<arbitrary>], iteration_bounds = array<i64: 1, 1>, scalar_prefetch = 0 : i64, scratch_operands = 1 : i64, tpu.core_type = #tpu.core_type<tc>, window_params = [{transform_indices = @transform_0, window_bounds = array<i64: 20, 20>}, {transform_indices = @transform_1, window_bounds = array<i64: 20, 128>}, {pipeline_mode = #tpu.pipeline_mode<synchronous>, transform_indices = @transform_2, window_bounds = array<i64: 128, 128>}, {transform_indices = @transform_3, window_bounds = array<i64: 20, 128>}]} {
    %c0_i32 = arith.constant 0 : i32
    %0 = arith.cmpi eq, %arg1, %c0_i32 : i32
    %1 = arith.extui %0 : i1 to i32
    %c0_i32_0 = arith.constant 0 : i32
    %2 = arith.cmpi ne, %1, %c0_i32_0 : i32
    scf.if %2 {
      %cst_10 = arith.constant 0.000000e+00 : f32
      %12 = vector.broadcast %cst_10 : f32 to vector<20x128xf32>
      %c0_11 = arith.constant 0 : index
      %c0_12 = arith.constant 0 : index
      %13 = vector.load %arg6[%c0_11, %c0_12] : memref<20x128xf32, #tpu.memory_space<vmem>>, vector<20x128xf32>
      tpu.vector_store %arg6[%c0_11, %c0_12], %12 {strides = array<i32>} : memref<20x128xf32, #tpu.memory_space<vmem>>, vector<20x128xf32>,
    } else {
    }
    %c0 = arith.constant 0 : index
    %c0_1 = arith.constant 0 : index
    %3 = vector.load %arg6[%c0, %c0_1] : memref<20x128xf32, #tpu.memory_space<vmem>>, vector<20x128xf32>
    %c0_2 = arith.constant 0 : index
    %c0_3 = arith.constant 0 : index
    %4 = vector.load %arg2[%c0_2, %c0_3] : memref<20x20xf32, #tpu.memory_space<vmem>>, vector<20x20xf32>
    %c0_4 = arith.constant 0 : index
    %c0_5 = arith.constant 0 : index
    %5 = vector.load %arg3[%c0_4, %c0_5] : memref<20x128xf32, #tpu.memory_space<vmem>>, vector<20x128xf32>
    %cst = arith.constant dense<0.000000e+00> : vector<20x128xf32>
    %6 = tpu.matmul %4, %5, %cst {dimension_numbers = #tpu.dot_dimension_numbers<[1], [0], [0], [1], [0, 0, 1, 1], [], []>} : vector<20x20xf32>, vector<20x128xf32>, vector<20x128xf32> -> vector<20x128xf32>
    %7 = arith.addf %3, %6 : vector<20x128xf32>
    %c0_6 = arith.constant 0 : index
    %c0_7 = arith.constant 0 : index
    %8 = vector.load %arg6[%c0_6, %c0_7] : memref<20x128xf32, #tpu.memory_space<vmem>>, vector<20x128xf32>
    tpu.vector_store %arg6[%c0_6, %c0_7], %7 {strides = array<i32>} : memref<20x128xf32, #tpu.memory_space<vmem>>, vector<20x128xf32>,
    %c0_i32_8 = arith.constant 0 : i32
    %9 = arith.cmpi eq, %arg1, %c0_i32_8 : i32
    %10 = arith.extui %9 : i1 to i32
    %c0_i32_9 = arith.constant 0 : i32
    %11 = arith.cmpi ne, %10, %c0_i32_9 : i32
    scf.if %11 {
      %c0_10 = arith.constant 0 : index
      %c0_11 = arith.constant 0 : index
      %12 = vector.load %arg6[%c0_10, %c0_11] : memref<20x128xf32, #tpu.memory_space<vmem>>, vector<20x128xf32>
      %c0_12 = arith.constant 0 : index
      %c0_13 = arith.constant 0 : index
      %13 = vector.load %arg4[%c0_12, %c0_13] : memref<128x128xf32, #tpu.memory_space<vmem>>, vector<128x128xf32>
      %cst_14 = arith.constant dense<0.000000e+00> : vector<20x128xf32>
      %14 = tpu.matmul %12, %13, %cst_14 {dimension_numbers = #tpu.dot_dimension_numbers<[1], [0], [0], [1], [0, 0, 1, 1], [], []>} : vector<20x128xf32>, vector<128x128xf32>, vector<20x128xf32> -> vector<20x128xf32>
      %c0_15 = arith.constant 0 : index
      %c0_16 = arith.constant 0 : index
      %15 = vector.load %arg5[%c0_15, %c0_16] : memref<20x128xf32, #tpu.memory_space<vmem>>, vector<20x128xf32>
      tpu.vector_store %arg5[%c0_15, %c0_16], %14 {strides = array<i32>} : memref<20x128xf32, #tpu.memory_space<vmem>>, vector<20x128xf32>,
    } else {
    }
    return
  }
  func.func @transform_0(%arg0: i32, %arg1: i32) -> (i32, i32) {
    %c0_i32 = arith.constant 0 : i32
    return %arg0, %arg1 : i32, i32
  }
  func.func @transform_1(%arg0: i32, %arg1: i32) -> (i32, i32) {
    %c0_i32 = arith.constant 0 : i32
    %c0_i32_0 = arith.constant 0 : i32
    return %arg1, %c0_i32 : i32, i32
  }
  func.func @transform_2(%arg0: i32, %arg1: i32) -> (i32, i32) {
    %c0_i32 = arith.constant 0 : i32
    %c0_i32_0 = arith.constant 0 : i32
    %c0_i32_1 = arith.constant 0 : i32
    return %c0_i32, %c0_i32_0 : i32, i32
  }
  func.func @transform_3(%arg0: i32, %arg1: i32) -> (i32, i32) {
    %c0_i32 = arith.constant 0 : i32
    %c0_i32_0 = arith.constant 0 : i32
    return %arg0, %c0_i32 : i32, i32
  }
}

</mosaic_0001>

<bundles_post_ra>
// kernel: tpu_custom_call.1
= control target key start
LH: loop header
LB: loop body
LE: loop exit
PB: predicated region body
PF: predicated region fallthrough
CT: control target
= control target key end

     0   :  { %8 = vsyncpa [#allocation4], 0  ;;  %s561_s0 = inlined_call_operand.hbm [shape: f32[20,20], index: 0, kind: input, shape index: {}]   ;;  %s562_s1 = inlined_call_operand.hbm [shape: f32[20,128], index: 1, kind: input, shape index: {}]   ;;  %s563_s2 = inlined_call_operand.hbm [shape: f32[128,128], index: 2, kind: input, shape index: {}]   ;;  %s564_s3 = inlined_call_operand.hbm [shape: f32[20,128], index: 3, kind: output, shape index: {}]  }
   0x1   :  { %9 = vsyncpa [#allocation7], 0 }
   0x2   :  { %10 = vsyncpa [#allocation5], 0  ;;  %s474_s12 = smov [#allocation6]   ;;  %s475_s14 = smov [#allocation3]  }
   0x3   :  { %s28_s13 = sshll.u32 %s474_s12, 4  ;;  %s16_s15 = sshll.u32 %s475_s14, 4  ;;  %s29_s13 = int_to_ptr.vmem [resolvable:$true] %s28_s13  ;;  %s17_s15 = int_to_ptr.vmem [resolvable:$true] %s16_s15 }
   0x4   :  { %s396_s16 = scalar_lea.vmem %s29_s13, 384  ;;  %p401_p1 = scmp.lt.s32.totalorder %s29_s13, %s29_s13 }
   0x5   :  { %p397_p0 = scmp.ne.s32.totalorder %s29_s13, %s396_s16  ;;  %p402_p2 = scmp.lt.s32.totalorder %s396_s16, %s396_s16 }
   0x7   :  { %p403_p3 = por %p402_p2, %p401_p1 }
   0x9   :  { %p404_p4 = pnand %p403_p3, %p397_p0 }
   0xb   :  { %407 = shalt.err (!%p404_p4)
}
   0xc   :  { %s476_s17 = smov 128   ;;  %s477_s18 = smov 8  }
   0xd   :  { %34 = dma.hbm_to_vmem [thread:$0]  %s562_s1, 384, %s29_s13, [#allocation7], %s476_s17, %s476_s17, %s477_s18  }
   0xe   :  { %s416_s21 = scalar_lea.vmem %s17_s15, 384  ;;  %p421_p6 = scmp.lt.s32.totalorder %s17_s15, %s17_s15 }
   0xf   :  { %p417_p5 = scmp.ne.s32.totalorder %s17_s15, %s416_s21  ;;  %p422_p7 = scmp.lt.s32.totalorder %s416_s21, %s416_s21 }
  0x11   :  { %p423_p8 = por %p422_p7, %p421_p6 }
  0x13   :  { %p424_p9 = pnand %p423_p8, %p417_p5 }
  0x15   :  { %427 = shalt.err (!%p424_p9)
}
  0x16   :  { %22 = dma.hbm_to_vmem [thread:$0]  %s561_s0, 384, %s17_s15, [#allocation4], %s476_s17, %s476_s17, %s477_s18  }
  0x17   :  { %s478_s24 = smov [#allocation8]  }
  0x18   :  { %s40_s25 = sshll.u32 %s478_s24, 4  ;;  %s41_s25 = int_to_ptr.vmem [resolvable:$true] %s40_s25 }
  0x19   :  { %s436_s26 = scalar_lea.vmem %s41_s25, 2048  ;;  %p441_p11 = scmp.lt.s32.totalorder %s41_s25, %s41_s25 }
  0x1a   :  { %p437_p10 = scmp.ne.s32.totalorder %s41_s25, %s436_s26  ;;  %p442_p12 = scmp.lt.s32.totalorder %s436_s26, %s436_s26 }
  0x1c   :  { %p443_p13 = por %p442_p12, %p441_p11 }
  0x1e   :  { %p444_p0 = pnand %p443_p13, %p437_p10 }
  0x20   :  { %447 = shalt.err (!%p444_p0)
}
  0x21   :  { %46 = dma.hbm_to_vmem [thread:$0]  %s563_s2, 2048, %s41_s25, [#allocation7], %s476_s17, %s476_s17, %s477_s18  }
  0x22   :  { %468 = dma.done.wait [#allocation4], 384  }
  0x23   :  { %469 = vsyncadd [#allocation4], 4294966912 }
  0x24   :  { %470 = dma.done.wait [#allocation7], 2432  }
  0x25   :  { %471 = vsyncadd [#allocation7], 4294964864  ;;  %v479_v0 = vmov 0.0   ;;  %vm480_vm0 = vmmov 0   ;;  %vm82_vm1 = vcmask 1043456   ;;  %v70_v2 = vld [vmem:[#allocation6 + $0x8] sm:$0xff] }
  0x26   :  { %324 = vmatprep.subr.mxu0 %v479_v0  ;;  %62 = vst [vmem:[#allocation2 + $0x8] sm:$0xf] %v479_v0  ;;  %330 = vmatprep.mubr.msk.f32.mxu0 %vm480_vm0, %v479_v0  ;;  %v71_v1 = vld [vmem:[#allocation6 + $0x10] sm:$0xf]  ;;  %v69_v3 = vld [vmem:[#allocation6] sm:$0xff]  ;;  %v192_v5 = vld [vmem:[#allocation8 + $0x70] sm:$0xff] }
  0x27   :  { %339 = vmatprep.subr.mxu1 %v479_v0  ;;  %371 = vmatprep.mubr.msk.f32.mxu1 %vm480_vm0, %v479_v0  ;;  %v193_v4 = vld [vmem:[#allocation8 + $0x78] sm:$0xff]  ;;  %v66_v6 = vld [vmem:[#allocation3] sm:$0xff]  ;;  %vm72_vm2 = vcmask 162816   ;;  %v191_v7 = vld [vmem:[#allocation8 + $0x68] sm:$0xff]  ;;  %s481_s0 = smov [#allocation9]  }
  0x28   :  { %325 = vmatpush3.msk.msra.mxu0 %vm82_vm1, %v71_v1  ;;  %340 = vmatpush3.msra.mxu1 %v193_v4  ;;  %v190_v8 = vld [vmem:[#allocation8 + $0x60] sm:$0xff]  ;;  %v67_v9 = vld [vmem:[#allocation3 + $0x8] sm:$0xff]  ;;  %v188_v11 = vld [vmem:[#allocation8 + $0x50] sm:$0xff]  ;;  %s282_s2 = sshll.u32 %s481_s0, 4  ;;  %s283_s2 = int_to_ptr.vmem [resolvable:$true] %s282_s2 }
  0x29   :  { %326 = vmatprep.subr.mxu0 %v479_v0  ;;  %341 = vmatprep.subr.mxu1 %v479_v0  ;;  %v189_v10 = vld [vmem:[#allocation8 + $0x58] sm:$0xff]  ;;  %v68_v12 = vld [vmem:[#allocation3 + $0x10] sm:$0xf]  ;;  %v187_v13 = vld [vmem:[#allocation8 + $0x48] sm:$0xff]  ;;  %s448_s28 = scalar_lea.vmem %s283_s2, 384  ;;  %p453_p2 = scmp.lt.s32.totalorder %s283_s2, %s283_s2 }
  0x2a   :  { %327 = vmatpush3.msra.mxu0 %v70_v2  ;;  %342 = vmatpush3.msra.mxu1 %v192_v5  ;;  %v186_v14 = vld [vmem:[#allocation8 + $0x40] sm:$0xff]  ;;  %v185_v15 = vld [vmem:[#allocation8 + $0x38] sm:$0xff]  ;;  %v184_v16 = vld [vmem:[#allocation8 + $0x30] sm:$0xff]  ;;  %p449_p1 = scmp.ne.s32.totalorder %s283_s2, %s448_s28  ;;  %p454_p3 = scmp.lt.s32.totalorder %s448_s28, %s448_s28 }
  0x2b   :  { %328 = vmatprep.subr.mxu0 %v479_v0  ;;  %343 = vmatprep.subr.mxu1 %v479_v0  ;;  %v183_v17 = vld [vmem:[#allocation8 + $0x28] sm:$0xff]  ;;  %v182_v18 = vld [vmem:[#allocation8 + $0x20] sm:$0xff]  ;;  %v181_v19 = vld [vmem:[#allocation8 + $0x18] sm:$0xff] }
  0x2c   :  { %329 = vmatpush3.msra.mxu0 %v69_v3  ;;  %344 = vmatpush3.msra.mxu1 %v191_v7  ;;  %v180_v20 = vld [vmem:[#allocation8 + $0x10] sm:$0xff]  ;;  %v179_v21 = vld [vmem:[#allocation8 + $0x8] sm:$0xff]  ;;  %v178_v22 = vld [vmem:[#allocation8] sm:$0xff]  ;;  %p455_p4 = por %p454_p3, %p453_p2 }
  0x2d   :  { %331 = vmatmul.mubr.msk.f32.vlgmr.msra.gmra.mxu0 %vm72_vm2, %v66_v6  ;;  %345 = vmatprep.subr.mxu1 %v479_v0  ;;  %v65_v27 = vld [vmem:[#allocation2 + $0x8] sm:$0xf] }
  0x2e   :  { %333 = vmatprep.mubr.msk.f32.mxu0 %vm480_vm0, %v479_v0  ;;  %346 = vmatpush3.msra.mxu1 %v190_v8  ;;  %p456_p5 = pnand %p455_p4, %p449_p1 }
  0x2f   :  { %347 = vmatprep.subr.mxu1 %v479_v0 }
  0x30   :  { %348 = vmatpush3.msra.mxu1 %v189_v10 }
  0x31   :  { %334 = vmatmul.mubr.msk.f32.gmra.mxu0 %vm72_vm2, %v67_v9  ;;  %349 = vmatprep.subr.mxu1 %v479_v0 }
  0x32   :  { %336 = vmatprep.mubr.msk.f32.mxu0 %vm480_vm0, %v479_v0  ;;  %350 = vmatpush3.msra.mxu1 %v188_v11 }
  0x33   :  { %351 = vmatprep.subr.mxu1 %v479_v0 }
  0x34   :  { %352 = vmatpush3.msra.mxu1 %v187_v13 }
  0x35   :  { %337 = vmatmul.mubr.msk.f32.gmra.mxu0 %vm72_vm2, %v68_v12  ;;  %353 = vmatprep.subr.mxu1 %v479_v0 }
  0x36   :  { %354 = vmatpush3.msra.mxu1 %v186_v14 }
  0x37   :  { %355 = vmatprep.subr.mxu1 %v479_v0 }
  0x38   :  { %356 = vmatpush3.msra.mxu1 %v185_v15 }
  0x39   :  { %357 = vmatprep.subr.mxu1 %v479_v0 }
  0x3a   :  { %358 = vmatpush3.msra.mxu1 %v184_v16 }
  0x3b   :  { %359 = vmatprep.subr.mxu1 %v479_v0 }
  0x3c   :  { %360 = vmatpush3.msra.mxu1 %v183_v17 }
  0x3d   :  { %361 = vmatprep.subr.mxu1 %v479_v0 }
  0x3e   :  { %362 = vmatpush3.msra.mxu1 %v182_v18 }
  0x3f   :  { %363 = vmatprep.subr.mxu1 %v479_v0 }
  0x40   :  { %364 = vmatpush3.msra.mxu1 %v181_v19 }
  0x41   :  { %365 = vmatprep.subr.mxu1 %v479_v0 }
  0x42   :  { %366 = vmatpush3.msra.mxu1 %v180_v20 }
  0x43   :  { %367 = vmatprep.subr.mxu1 %v479_v0 }
  0x44   :  { %368 = vmatpush3.msra.mxu1 %v179_v21 }
  0x45   :  { %369 = vmatprep.subr.mxu1 %v479_v0 }
  0x46   :  { %370 = vmatpush3.msra.mxu1 %v178_v22 }
  0xed   :  { %v152_v23 = vpop.f32.mrf.mxu0 }
  0xee   :  { %372 = vmatmul.mubr.f32.vlgmr.msra.gmra.mxu1 %v152_v23 }
  0xef   :  { %v332_v24 = vpop.f32.mrf.mxu0  ;;  %374 = vmatprep.mubr.msk.f32.mxu1 %vm480_vm0, %v479_v0 }
  0xf1   :  { %v157_v25 = vpop.f32.mrf.mxu0 }
  0xf2   :  { %375 = vmatmul.mubr.f32.gmra.mxu1 %v157_v25 }
  0xf3   :  { %v335_v26 = vpop.f32.mrf.mxu0  ;;  %377 = vmatprep.mubr.msk.f32.mxu1 %vm480_vm0, %v479_v0 }
  0xf5   :  { %v162_v28 = vpop.f32.mrf.mxu0 }
  0xf6   :  { %v168_v29 = vadd.f32 %v162_v28, %v65_v27 }
  0xf7   :  { %v338_v30 = vpop.f32.mrf.mxu0 }
  0xf8   :  { %171 = vst [vmem:[#allocation2 + $0x8] sm:$0xf] %v168_v29 }
  0xff   :  { %v177_v31 = vld [vmem:[#allocation2 + $0x8] sm:$0xf] }
 0x100   :  { %378 = vmatmul.mubr.f32.gmra.mxu1 %v177_v31 }
 0x1ae   :  { %v260_v32 = vpop.f32.mrf.mxu1 }
 0x1af   :  { %274 = vst [vmem:[#allocation9] sm:$0xff] %v260_v32 }
 0x1b0   :  { %v373_v33 = vpop.f32.mrf.mxu1 }
 0x1b2   :  { %v265_v34 = vpop.f32.mrf.mxu1 }
 0x1b3   :  { %275 = vst [vmem:[#allocation9 + $0x8] sm:$0xff] %v265_v34 }
 0x1b4   :  { %v376_v35 = vpop.f32.mrf.mxu1 }
 0x1c0   :  { %v270_v36 = vpop.f32.mrf.mxu1 }
 0x1c1   :  { %276 = vst [vmem:[#allocation9 + $0x10] sm:$0xf] %v270_v36 }
 0x1c2   :  { %v379_v37 = vpop.f32.mrf.mxu1 }
 0x1c3   :  { %459 = shalt.err (!%p456_p5)
}
 0x1c4   :  { %288 = dma.vmem_to_hbm [thread:$0]  %s283_s2, 384, %s564_s3, [#allocation5], %s476_s17, %s476_s17, %s477_s18  }
 0x1c5   :  { %472 = dma.done.wait [#allocation5], 384  }
 0x1c6   :  { %473 = vsyncadd [#allocation5], 4294966912 }
 0x1c7   :  { %292 = vsyncpa [#allocation4], 1 }
 0x1c8   :  { %293 = vsyncpa [#allocation7], 1 }
 0x1c9   :  { %294 = vsyncpa [#allocation5], 1 }

</bundles_post_ra>
